<compile_context>
chip_gen: v7x
topology: tpu7x:2x2x1
jax: 0.10.0
libtpu: 0.0.40
codegen_flags: <defaults>
</compile_context>

<pallas_src>
import jax
import jax.numpy as jnp
from jax.experimental import pallas as pl
from jax.experimental.pallas import tpu as pltpu


def _rope_kernel(x_ref, cos_ref, sin_ref, o_ref):
    # x_ref block: (TB, TS, D); cos/sin block: (TS, D), f32, interleaved.
    x = x_ref[...]
    d = x.shape[-1]
    lane_axis = x.ndim - 1

    # Pair swap along the lane (feature) axis:
    #   even lane 2i   <- x[2i + 1]   (rotate by D-1  == roll by -1)
    #   odd  lane 2i+1 <- x[2i]       (rotate by  +1)
    lane = jax.lax.broadcasted_iota(jnp.int32, x.shape, dimension=lane_axis)
    is_even = (lane % 2) == 0
    swapped = jnp.where(
        is_even,
        pltpu.roll(x, shift=d - 1, axis=lane_axis),
        pltpu.roll(x, shift=1, axis=lane_axis),
    )

    # cos_ref is cos(theta) duplicated onto both lanes of each pair; sin_ref is
    # sin(theta) duplicated and sign-flipped on even lanes (-sin) / odd (+sin):
    #   out[2i]   = cos*x[2i]   - sin*x[2i+1]
    #   out[2i+1] = cos*x[2i+1] + sin*x[2i]
    # Compute in f32 (angle tables are f32; safe on v5e which has no bf16 VPU).
    out = (x.astype(jnp.float32) * cos_ref[...]
           + swapped.astype(jnp.float32) * sin_ref[...])
    o_ref[...] = out.astype(o_ref.dtype)


def _choose_tiles(B, S, D, itemsize, budget_bytes=1 << 20):
    """Pick block shape (TB, TS, D) targeting ~budget_bytes per buffer."""
    row_bytes = D * itemsize
    # Tile the sequence axis (keeps positions aligned with the trig tables).
    if S * row_bytes <= budget_bytes:
        ts = S
    elif S % 8 == 0:
        ts = 8
        t = 8
        while t <= S:
            if S % t == 0 and t * row_bytes <= budget_bytes:
                ts = t
            t += 8
    else:
        ts = S  # cannot tile cleanly under the (8,128) rule; take the full axis
    # If a full-S tile is still small, bundle several batches per block.
    tb = 1
    if ts == S:
        for cand in range(1, B + 1):
            if B % cand == 0 and cand * S * row_bytes <= budget_bytes:
                tb = cand
    return tb, ts


def rotary_positional_encoding(x):
    """Pallas implementation of RotaryPositionalEncoding.forward.

    x: (B, S, D) array, D even. Returns array of same shape/dtype.
    """
    B, S, D = x.shape
    assert D % 2 == 0, "feature dim must be even for RoPE pairs"
    half = D // 2

    # Hoisted trig tables (tiny (S, D) f32 arrays), interleaved to lane width D:
    #   cos_t[s, 2i] = cos_t[s, 2i+1] = cos(theta[s, i])
    #   sin_t[s, 2i] = -sin(theta[s, i]), sin_t[s, 2i+1] = +sin(theta[s, i])
    pos = jnp.arange(S, dtype=jnp.float32)[:, None]                  # (S, 1)
    inv_freq = jnp.power(
        10000.0, -2.0 * jnp.arange(half, dtype=jnp.float32) / D)     # (half,)
    theta = pos * inv_freq                                           # (S, half)
    cos_t = jnp.repeat(jnp.cos(theta), 2, axis=-1)                   # (S, D)
    sign = jnp.tile(jnp.array([-1.0, 1.0], jnp.float32), half)       # (D,)
    sin_t = jnp.repeat(jnp.sin(theta), 2, axis=-1) * sign            # (S, D)

    tb, ts = _choose_tiles(B, S, D, x.dtype.itemsize)
    grid = (B // tb, S // ts)

    x_spec = pl.BlockSpec((tb, ts, D), lambda b, s: (b, s, 0))
    tab_spec = pl.BlockSpec((ts, D), lambda b, s: (s, 0))

    out = pl.pallas_call(
        _rope_kernel,
        out_shape=jax.ShapeDtypeStruct((B, S, D), x.dtype),
        grid_spec=pltpu.PrefetchScalarGridSpec(
            num_scalar_prefetch=0,
            grid=grid,
            in_specs=[x_spec, tab_spec, tab_spec],
            out_specs=x_spec,
        ),
        compiler_params=pltpu.CompilerParams(
            dimension_semantics=("parallel", "parallel"),
            vmem_limit_bytes=32 * 1024 * 1024,
        ),
    )(x, cos_t, sin_t)
    return out


def rope_reference(x):
    """Pure-JAX reference mirroring the PyTorch forward exactly."""
    B, S, D = x.shape
    H = D // 2
    pos = jnp.arange(S, dtype=jnp.float32)[:, None]                  # (S, 1)
    theta = pos / jnp.power(
        10000.0, 2.0 * jnp.arange(H, dtype=jnp.float32) / D
    )                                                                # (S, H)
    sin_t = jnp.sin(theta)
    cos_t = jnp.cos(theta)
    xe = x[..., 0::2]
    xo = x[..., 1::2]
    re = cos_t * xe - sin_t * xo
    ro = sin_t * xe + cos_t * xo
    return jnp.stack([re, ro], axis=-1).reshape(B, S, D)


if __name__ == "__main__":
    # Small shapes consistent with the module: batch=2, seq=8, hidden=32.
    key = jax.random.PRNGKey(0)
    B, S, D = 2, 8, 32
    x = jax.random.normal(key, (B, S, D), dtype=jnp.float32)

    out = rotary_positional_encoding(x)
    out = jax.block_until_ready(out)

    ref = rope_reference(x)
    assert out.shape == x.shape and out.dtype == x.dtype
    assert jnp.allclose(out, ref, atol=1e-5, rtol=1e-5), (
        "Pallas RoPE output mismatch vs reference"
    )

    print("KERNEL_OK")
</pallas_src>

<mosaic_0001>
module attributes {stable_mosaic.version = 11 : i64} {
  func.func @_rope_kernel(%arg0: i32, %arg1: i32, %arg2: memref<2x8x32xf32, #tpu.memory_space<vmem>>, %arg3: memref<8x32xf32, #tpu.memory_space<vmem>>, %arg4: memref<8x32xf32, #tpu.memory_space<vmem>>, %arg5: memref<2x8x32xf32, #tpu.memory_space<vmem>>) attributes {dimension_semantics = [#tpu.dimension_semantics<parallel>, #tpu.dimension_semantics<parallel>], iteration_bounds = array<i64: 1, 1>, scalar_prefetch = 0 : i64, scratch_operands = 0 : i64, tpu.core_type = #tpu.core_type<tc>, window_params = [{transform_indices = @transform_0, window_bounds = array<i64: 2, 8, 32>}, {transform_indices = @transform_1, window_bounds = array<i64: 8, 32>}, {transform_indices = @transform_2, window_bounds = array<i64: 8, 32>}, {transform_indices = @transform_3, window_bounds = array<i64: 2, 8, 32>}]} {
    %c0 = arith.constant 0 : index
    %c0_0 = arith.constant 0 : index
    %c0_1 = arith.constant 0 : index
    %0 = vector.load %arg2[%c0, %c0_0, %c0_1] : memref<2x8x32xf32, #tpu.memory_space<vmem>>, vector<2x8x32xf32>
    %1 = tpu.iota {dimensions = array<i32: 2>} : vector<2x8x32xi32>
    %c2_i32 = arith.constant 2 : i32
    %c0_i32 = arith.constant 0 : i32
    %2 = arith.cmpi eq, %c2_i32, %c0_i32 : i32
    %c1_i32 = arith.constant 1 : i32
    %3 = arith.select %2, %c1_i32, %c2_i32 : i32
    %4 = vector.broadcast %3 : i32 to vector<2x8x32xi32>
    %5 = arith.remsi %1, %4 : vector<2x8x32xi32>
    %c0_i32_2 = arith.constant 0 : i32
    %6 = vector.broadcast %c0_i32_2 : i32 to vector<2x8x32xi32>
    %7 = arith.cmpi ne, %5, %6 : vector<2x8x32xi32>
    %c0_i32_3 = arith.constant 0 : i32
    %8 = vector.broadcast %c0_i32_3 : i32 to vector<2x8x32xi32>
    %9 = arith.cmpi slt, %5, %8 : vector<2x8x32xi32>
    %c0_i32_4 = arith.constant 0 : i32
    %10 = arith.cmpi slt, %3, %c0_i32_4 : i32
    %11 = vector.broadcast %10 : i1 to vector<2x8x32xi1>
    %12 = vector.broadcast %11 : vector<2x8x32xi1> to vector<2x8x32xi1>
    %13 = arith.xori %9, %12 : vector<2x8x32xi1>
    %14 = arith.andi %13, %7 : vector<2x8x32xi1>
    %15 = vector.broadcast %3 : i32 to vector<2x8x32xi32>
    %16 = arith.addi %5, %15 : vector<2x8x32xi32>
    %17 = arith.select %14, %16, %5 : vector<2x8x32xi1>, vector<2x8x32xi32>
    %c0_i32_5 = arith.constant 0 : i32
    %18 = vector.broadcast %c0_i32_5 : i32 to vector<2x8x32xi32>
    %19 = arith.cmpi eq, %17, %18 : vector<2x8x32xi32>
    %c31_i32 = arith.constant 31 : i32
    %20 = tpu.dynamic_rotate %0 by %c31_i32 dim 2 : vector<2x8x32xf32>, i32 -> vector<2x8x32xf32>
    %c1_i32_6 = arith.constant 1 : i32
    %21 = tpu.dynamic_rotate %0 by %c1_i32_6 dim 2 : vector<2x8x32xf32>, i32 -> vector<2x8x32xf32>
    %22 = arith.select %19, %20, %21 : vector<2x8x32xi1>, vector<2x8x32xf32>
    %c0_7 = arith.constant 0 : index
    %c0_8 = arith.constant 0 : index
    %23 = vector.load %arg3[%c0_7, %c0_8] : memref<8x32xf32, #tpu.memory_space<vmem>>, vector<8x32xf32>
    %24 = vector.shape_cast %23 : vector<8x32xf32> to vector<1x8x32xf32>
    %25 = vector.broadcast %24 : vector<1x8x32xf32> to vector<2x8x32xf32>
    %26 = arith.mulf %0, %25 : vector<2x8x32xf32>
    %c0_9 = arith.constant 0 : index
    %c0_10 = arith.constant 0 : index
    %27 = vector.load %arg4[%c0_9, %c0_10] : memref<8x32xf32, #tpu.memory_space<vmem>>, vector<8x32xf32>
    %28 = vector.shape_cast %27 : vector<8x32xf32> to vector<1x8x32xf32>
    %29 = vector.broadcast %28 : vector<1x8x32xf32> to vector<2x8x32xf32>
    %30 = arith.mulf %22, %29 : vector<2x8x32xf32>
    %31 = arith.addf %26, %30 : vector<2x8x32xf32>
    %c0_11 = arith.constant 0 : index
    %c0_12 = arith.constant 0 : index
    %c0_13 = arith.constant 0 : index
    %32 = vector.load %arg5[%c0_11, %c0_12, %c0_13] : memref<2x8x32xf32, #tpu.memory_space<vmem>>, vector<2x8x32xf32>
    tpu.vector_store %arg5[%c0_11, %c0_12, %c0_13], %31 {strides = array<i32>} : memref<2x8x32xf32, #tpu.memory_space<vmem>>, vector<2x8x32xf32>,
    return
  }
  func.func @transform_0(%arg0: i32, %arg1: i32) -> (i32, i32, i32) {
    %c0_i32 = arith.constant 0 : i32
    %c0_i32_0 = arith.constant 0 : i32
    return %arg0, %arg1, %c0_i32 : i32, i32, i32
  }
  func.func @transform_1(%arg0: i32, %arg1: i32) -> (i32, i32) {
    %c0_i32 = arith.constant 0 : i32
    %c0_i32_0 = arith.constant 0 : i32
    return %arg1, %c0_i32 : i32, i32
  }
  func.func @transform_2(%arg0: i32, %arg1: i32) -> (i32, i32) {
    %c0_i32 = arith.constant 0 : i32
    %c0_i32_0 = arith.constant 0 : i32
    return %arg1, %c0_i32 : i32, i32
  }
  func.func @transform_3(%arg0: i32, %arg1: i32) -> (i32, i32, i32) {
    %c0_i32 = arith.constant 0 : i32
    %c0_i32_0 = arith.constant 0 : i32
    return %arg0, %arg1, %c0_i32 : i32, i32, i32
  }
}

</mosaic_0001>

<bundles_post_ra>
// kernel: tpu_custom_call.1
= control target key start
LH: loop header
LB: loop body
LE: loop exit
PB: predicated region body
PF: predicated region fallthrough
CT: control target
= control target key end

     0   :  { %8 = vsyncpa [#allocation3], 0  ;;  %s320_s0 = inlined_call_operand.hbm [shape: f32[2,8,32], index: 0, kind: input, shape index: {}]   ;;  %s321_s1 = inlined_call_operand.hbm [shape: f32[8,32], index: 1, kind: input, shape index: {}]   ;;  %s322_s2 = inlined_call_operand.hbm [shape: f32[8,32], index: 2, kind: input, shape index: {}]   ;;  %s323_s3 = inlined_call_operand.hbm [shape: f32[2,8,32], index: 3, kind: output, shape index: {}]  }
   0x1   :  { %9 = vsyncpa [#allocation6], 0 }
   0x2   :  { %10 = vsyncpa [#allocation4], 0  ;;  %s230_s12 = smov [#allocation5]   ;;  %s231_s14 = smov [#allocation2]  }
   0x3   :  { %s29_s13 = sshll.u32 %s230_s12, 4  ;;  %s16_s15 = sshll.u32 %s231_s14, 4  ;;  %s30_s13 = int_to_ptr.vmem [resolvable:$true] %s29_s13  ;;  %s259_s15 = int_to_ptr.vmem [resolvable:$true] %s16_s15 }
   0x4   :  { %s136_s18 = scalar_lea.hbm %s321_s1, 128 }
   0x5   :  { %p137_p0 = scmp.ne.s32.totalorder %s321_s1, %s136_s18  ;;  %p140_p1 = scmp.lt.u32.totalorder %s136_s18, %s321_s1 }
   0x7   :  { %p142_p2 = pnand %p140_p1, %p137_p0 }
   0x9   :  { %145 = shalt.err (!%p142_p2)
}
   0xa   :  { %s146_s23 = scalar_lea.vmem %s30_s13, 128  ;;  %p151_p4 = scmp.lt.s32.totalorder %s30_s13, %s30_s13 }
   0xb   :  { %p147_p3 = scmp.ne.s32.totalorder %s30_s13, %s146_s23  ;;  %p152_p5 = scmp.lt.s32.totalorder %s146_s23, %s146_s23 }
   0xd   :  { %p153_p6 = por %p152_p5, %p151_p4 }
   0xf   :  { %p154_p7 = pnand %p153_p6, %p147_p3 }
  0x11   :  { %157 = shalt.err (!%p154_p7)
}
  0x12   :  { %32 = dma.hbm_to_vmem [thread:$0]  %s321_s1, 128, %s30_s13, [#allocation6]  }
  0x13   :  { %s158_s28 = scalar_lea.hbm %s320_s0, 256 }
  0x14   :  { %p159_p8 = scmp.ne.s32.totalorder %s320_s0, %s158_s28  ;;  %p162_p9 = scmp.lt.u32.totalorder %s158_s28, %s320_s0 }
  0x16   :  { %p164_p10 = pnand %p162_p9, %p159_p8 }
  0x18   :  { %167 = shalt.err (!%p164_p10)
}
  0x19   :  { %s168_s6 = scalar_lea.vmem %s259_s15, 256  ;;  %p173_p12 = scmp.lt.s32.totalorder %s259_s15, %s259_s15 }
  0x1a   :  { %p169_p11 = scmp.ne.s32.totalorder %s259_s15, %s168_s6  ;;  %p174_p13 = scmp.lt.s32.totalorder %s168_s6, %s168_s6 }
  0x1c   :  { %p175_p0 = por %p174_p13, %p173_p12 }
  0x1e   :  { %p176_p1 = pnand %p175_p0, %p169_p11 }
  0x20   :  { %179 = shalt.err (!%p176_p1)
}
  0x21   :  { %s232_s1 = smov 128   ;;  %s233_s7 = smov 8  }
  0x22   :  { %22 = dma.hbm_to_vmem [thread:$0]  %s320_s0, 256, %s259_s15, [#allocation3], %s232_s1, %s232_s1, %s233_s7  }
  0x23   :  { %s234_s10 = smov [#allocation7]   ;;  %s180_s14 = scalar_lea.hbm %s322_s2, 128 }
  0x24   :  { %s39_s11 = sshll.u32 %s234_s10, 4  ;;  %p181_p2 = scmp.ne.s32.totalorder %s322_s2, %s180_s14  ;;  %s40_s11 = int_to_ptr.vmem [resolvable:$true] %s39_s11 }
  0x25   :  { %p184_p3 = scmp.lt.u32.totalorder %s180_s14, %s322_s2 }
  0x27   :  { %p186_p4 = pnand %p184_p3, %p181_p2 }
  0x29   :  { %189 = shalt.err (!%p186_p4)
}
  0x2a   :  { %s190_s20 = scalar_lea.vmem %s40_s11, 128  ;;  %p195_p6 = scmp.lt.s32.totalorder %s40_s11, %s40_s11 }
  0x2b   :  { %p191_p5 = scmp.ne.s32.totalorder %s40_s11, %s190_s20  ;;  %p196_p7 = scmp.lt.s32.totalorder %s190_s20, %s190_s20 }
  0x2d   :  { %p197_p8 = por %p196_p7, %p195_p6 }
  0x2f   :  { %p198_p9 = pnand %p197_p8, %p191_p5 }
  0x31   :  { %201 = shalt.err (!%p198_p9)
}
  0x32   :  { %42 = dma.hbm_to_vmem [thread:$0]  %s322_s2, 128, %s40_s11, [#allocation6]  }
  0x33   :  { %224 = dma.done.wait [#allocation3], 256  }
  0x34   :  { %225 = vsyncadd [#allocation3], 4294967040 }
  0x35   :  { %226 = dma.done.wait [#allocation6], 256  }
  0x36   :  { %227 = vsyncadd [#allocation6], 4294967040  ;;  %v52_v0 = vld [vmem:[#allocation2] sm:$0xff]  ;;  %s235_s21 = smov 32   ;;  %v53_v1 = vld [vmem:[#allocation2 + $0x8] sm:$0xff]  ;;  %vm69_vm0 = vcmask 1047808   ;;  %v54_v10 = vlaneseq }
  0x37   :  { %70 = vrot.lane.b32.xlu0 %v52_v0, %s235_s21  ;;  %s236_s22 = smov 127   ;;  %s237_s2 = smov 97   ;;  %v98_v14 = vld [vmem:[#allocation5] sm:$0xff]  ;;  %v101_v15 = vld [vmem:[#allocation7] sm:$0xff]  ;;  %vm106_vm2 = vcmask 261120  }
  0x38   :  { %v55_v11 = vand.u32 127, %v54_v10  ;;  %v99_v18 = vmul.f32 %v98_v14, %v52_v0  ;;  %v100_v22 = vmul.f32 %v98_v14, %v53_v1  ;;  %s238_s23 = smov [#allocation8]  }
  0x39   :  { %s114_s24 = sshll.u32 %s238_s23, 4  ;;  %s115_s24 = int_to_ptr.vmem [resolvable:$true] %s114_s24 }
  0x3a   :  { %v60_v12 = vand.u32 1, %v55_v11  ;;  %s202_s25 = scalar_lea.vmem %s115_s24, 256  ;;  %p207_p11 = scmp.lt.s32.totalorder %s115_s24, %s115_s24 }
  0x3b   :  { %73 = vrot.lane.b32.xlu0 %v53_v1, %s235_s21  ;;  %p203_p10 = scmp.ne.s32.totalorder %s115_s24, %s202_s25  ;;  %p208_p12 = scmp.lt.s32.totalorder %s202_s25, %s202_s25 }
  0x3c   :  { %vm68_vm1 = vcmp.eq.s32.totalorder %v60_v12, 0 }
  0x3d   :  { %p209_p13 = por %p208_p12, %p207_p11 }
  0x3f   :  { %p210_p0 = pnand %p209_p13, %p203_p10 }
  0xa9   :  { %v71_v2 = vpop.permute.xlu0 %70 }
  0xaa   :  { %v72_v3 = vsel %vm69_vm0, %v71_v2, %v52_v0 }
  0xab   :  { %76 = vrot.lane.b32.xlu1 %v72_v3, %s235_s21 }
  0xad   :  { %v74_v4 = vpop.permute.xlu0 %73 }
  0xae   :  { %v75_v5 = vsel %vm69_vm0, %v74_v4, %v53_v1 }
  0xaf   :  { %78 = vrot.lane.b32.xlu1 %v75_v5, %s235_s21 }
 0x11d   :  { %v77_v6 = vpop.permute.xlu1 %76 }
 0x11e   :  { %v80_v7 = vsel %vm69_vm0, %v77_v6, %v52_v0 }
 0x11f   :  { %84 = vrot.lane.b32.xlu0 %v80_v7, %s236_s22 }
 0x121   :  { %v79_v8 = vpop.permute.xlu1 %78 }
 0x122   :  { %v81_v9 = vsel %vm69_vm0, %v79_v8, %v53_v1 }
 0x123   :  { %90 = vrot.lane.b32.xlu0 %v80_v7, %s237_s2  ;;  %86 = vrot.lane.b32.xlu1 %v81_v9, %s236_s22 }
 0x127   :  { %92 = vrot.lane.b32.xlu1 %v81_v9, %s237_s2 }
 0x191   :  { %v85_v13 = vpop.permute.xlu0 %84 }
 0x195   :  { %v87_v16 = vpop.permute.xlu1 %86  ;;  %v91_v17 = vpop.permute.xlu0 %90 }
 0x196   :  { %v96_v19 = vsel %vm68_vm1, %v85_v13, %v91_v17 }
 0x197   :  { %v102_v20 = vmul.f32 %v101_v15, %v96_v19 }
 0x199   :  { %v104_v21 = vadd.f32 %v102_v20, %v99_v18  ;;  %v93_v23 = vpop.permute.xlu1 %92 }
 0x19a   :  { %v97_v24 = vsel %vm68_vm1, %v87_v16, %v93_v23 }
 0x19b   :  { %v103_v25 = vmul.f32 %v101_v15, %v97_v24  ;;  %107 = vst.msk [vmem:[#allocation8] sm:$0xff] %vm106_vm2, %v104_v21 }
 0x19d   :  { %v105_v26 = vadd.f32 %v103_v25, %v100_v22 }
 0x19f   :  { %108 = vst.msk [vmem:[#allocation8 + $0x8] sm:$0xff] %vm106_vm2, %v105_v26 }
 0x1a0   :  { %213 = shalt.err (!%p210_p0)
}
 0x1a1   :  { %s214_s28 = scalar_lea.hbm %s323_s3, 256 }
 0x1a2   :  { %p215_p1 = scmp.ne.s32.totalorder %s323_s3, %s214_s28  ;;  %p218_p2 = scmp.lt.u32.totalorder %s214_s28, %s323_s3 }
 0x1a4   :  { %p220_p3 = pnand %p218_p2, %p215_p1 }
 0x1a6   :  { %223 = shalt.err (!%p220_p3)
}
 0x1a7   :  { %120 = dma.vmem_to_hbm [thread:$0]  %s115_s24, 256, %s323_s3, [#allocation4], %s232_s1, %s232_s1, %s233_s7  }
 0x1a8   :  { %228 = dma.done.wait [#allocation4], 256  }
 0x1a9   :  { %229 = vsyncadd [#allocation4], 4294967040 }
 0x1aa   :  { %124 = vsyncpa [#allocation3], 1 }
 0x1ab   :  { %125 = vsyncpa [#allocation6], 1 }
 0x1ac   :  { %126 = vsyncpa [#allocation4], 1 }

</bundles_post_ra>
